<compile_context>
chip_gen: v6e
topology: v6e:2x2x1
jax: 0.10.0
libtpu: 0.0.40
codegen_flags: <defaults>
</compile_context>

<pallas_src>
import numpy as np
import jax
import jax.numpy as jnp
from jax.experimental import pallas as pl
from jax.experimental.pallas import tpu as pltpu


# ----------------------------------------------------------------------------
# Pallas kernel: zero out the dropped feature columns.
# ----------------------------------------------------------------------------
def _chunk_dropout_kernel(x_ref, mask_ref, o_ref):
    x = x_ref[...]                     # (tile_b, tile_l)
    m = mask_ref[...]                  # (1, tile_l), nonzero => drop column
    # Exact "x[:, mask] = 0" assignment semantics (NaN/Inf in dropped columns
    # become exactly 0, unlike a multiply-by-mask).
    o_ref[...] = jnp.where(m != 0, jnp.zeros_like(x), x)


def _sublane_multiple(dtype) -> int:
    """Sublane packing multiple: 8 for 32-bit, 16 for bf16, 32 for int8/fp8."""
    bits = jnp.dtype(dtype).itemsize * 8
    return max(8, (32 // bits) * 8) if bits <= 32 else 8


def chunk_dropout_apply(x, drop_mask, *, tile_b=None, tile_l=None,
                        in_place=False):
    """Zero out dropped feature columns of x with a Pallas TPU kernel.

    x:         (B, L) array.
    drop_mask: (L,) bool/int mask (numpy or jax); True/nonzero => drop column.
    tile_b/tile_l: optional block-size overrides.
    in_place:  if True, alias the output onto x's HBM buffer
               (input_output_aliases={0: 0}); only use when x is donated /
               never read again by the caller (matches PyTorch's in-place
               mutation semantics).
    """
    B, L = x.shape
    itemsize = jnp.dtype(x.dtype).itemsize

    # --- Block sizing: this is a purely mem-bound elementwise kernel, so pick
    # large blocks (~4 MiB of x per block).  Double-buffered in + out is then
    # ~16 MiB, which fits the default scoped VMEM on v6e/v7x and comfortably
    # under the 32 MiB limit we request explicitly (also fine on v5e's 128 MiB
    # physical VMEM and v7x's 64 MiB physical VMEM).
    if tile_l is None:
        # Lane dim: multiple of 128, or the full (possibly unaligned) L.
        tile_l = L if L <= 2048 else 2048
    if tile_b is None:
        sub = _sublane_multiple(x.dtype)        # 8 f32 / 16 bf16 / 32 int8
        target_block_bytes = 4 * 1024 * 1024
        rows = max(sub, target_block_bytes // max(1, tile_l * itemsize))
        tile_b = B if rows >= B else max(sub, (rows // sub) * sub)

    # Mask in x's dtype: host-side cast when possible (no extra XLA convert
    # dispatch), tiny VMEM footprint, same vreg layout as x.
    if isinstance(drop_mask, np.ndarray):
        mask2d = jnp.asarray(
            np.ascontiguousarray(drop_mask.reshape(1, L)).astype(
                np.dtype(x.dtype), copy=False))
    else:
        mask2d = jnp.reshape(drop_mask, (1, L)).astype(x.dtype)

    # pl.cdiv grid: ragged boundary blocks are handled (masked writes), so an
    # arbitrary B / L never forces a tiny tile.
    grid = (pl.cdiv(B, tile_b), pl.cdiv(L, tile_l))

    return pl.pallas_call(
        _chunk_dropout_kernel,
        out_shape=jax.ShapeDtypeStruct((B, L), x.dtype),
        grid_spec=pltpu.PrefetchScalarGridSpec(
            num_scalar_prefetch=0,
            grid=grid,
            in_specs=[
                pl.BlockSpec((tile_b, tile_l), lambda i, j: (i, j)),   # x
                pl.BlockSpec((1, tile_l), lambda i, j: (0, j)),        # mask
            ],
            out_specs=pl.BlockSpec((tile_b, tile_l), lambda i, j: (i, j)),
        ),
        compiler_params=pltpu.CompilerParams(
            # Both axes independent -> megacore / 2-TC sharding on v7x once
            # the grid has >= 2 iterations.
            dimension_semantics=("parallel", "parallel"),
            vmem_limit_bytes=32 * 1024 * 1024,
        ),
        input_output_aliases=({0: 0} if in_place else {}),
    )(x, mask2d)


# ----------------------------------------------------------------------------
# Module wrapper (forward pass only).
# ----------------------------------------------------------------------------
class ChunkDropoutJax:
    """JAX/Pallas port of ChunkDropout."""

    # Below this many bytes the pallas_call is pure launch/DMA overhead; a
    # plain jnp.where lets XLA fuse the mask with neighbouring ops instead.
    _PALLAS_MIN_BYTES = 1 << 20

    def __init__(self, input_length, dropout_probability, hole_length_loc,
                 hole_length_scale, minimum_hole_length=None, seed=0):
        self.input_length = int(input_length)
        self.dropout_probability = float(dropout_probability)
        self.hole_length_loc = hole_length_loc
        self.hole_length_scale = hole_length_scale
        self.minimum_hole_length = (1 if minimum_hole_length is None
                                    else int(minimum_hole_length))
        self._rng = np.random.default_rng(seed)
        self.training = True

    def get_dropout_indices(self):
        """Mirrors ChunkDropout.get_dropout_indices (numpy RNG stands in for
        torch's Geometric / Normal samplers)."""
        output = np.zeros(self.input_length, dtype=bool)
        last_gap = (0, 0)
        while True:
            # torch Geometric(p) counts failures before the first success
            # (support {0,1,...}); numpy's geometric counts trials ({1,2,...}).
            new_gap_offset = int(self._rng.geometric(self.dropout_probability)) - 1
            if new_gap_offset == 0:
                new_gap_offset += 1
            gap_start = last_gap[1] + new_gap_offset
            if gap_start >= self.input_length - 1:
                return output
            gap_length = int(self._rng.normal(
                loc=float(self.hole_length_loc),
                scale=float(self.hole_length_scale)))
            if gap_length < self.minimum_hole_length:
                gap_length = self.minimum_hole_length
            gap_end = gap_start + gap_length
            if gap_end > self.input_length:
                gap_end = self.input_length
            last_gap = (int(gap_start), int(gap_end))
            output[last_gap[0]:last_gap[1]] = True
            if gap_end >= self.input_length:
                return output

    def __call__(self, x):
        if not self.training:
            return x
        mask_np = self.get_dropout_indices()
        if x.size * jnp.dtype(x.dtype).itemsize < self._PALLAS_MIN_BYTES:
            # Tiny inputs: fused XLA elementwise beats a standalone kernel.
            return jnp.where(jnp.asarray(mask_np)[None, :],
                             jnp.zeros_like(x), x)
        return chunk_dropout_apply(x, mask_np)


if __name__ == "__main__":
    key = jax.random.PRNGKey(0)

    mod = ChunkDropoutJax(
        input_length=256,
        dropout_probability=0.05,
        hole_length_loc=8,
        hole_length_scale=3,
        minimum_hole_length=1,
        seed=0,
    )
    mod.training = True

    # --- Kernel check 1: small module-consistent shape (batch=8, 256 features).
    B, L = 8, 256
    x = jax.random.normal(key, (B, L), dtype=jnp.float32)
    mask_np = mod.get_dropout_indices()
    out = jax.block_until_ready(chunk_dropout_apply(x, mask_np))
    ref = np.asarray(x).copy()
    ref[:, mask_np] = 0.0
    np.testing.assert_array_equal(np.asarray(out), ref)

    # --- Kernel check 2: multi-tile grid with ragged boundary blocks
    # (exercises the pl.cdiv / partial-block path and the 2-D parallel grid).
    B2, L2 = 20, 320
    x2 = jax.random.normal(jax.random.PRNGKey(1), (B2, L2), dtype=jnp.float32)
    mask2_np = np.zeros(L2, dtype=bool)
    mask2_np[5:17] = True
    mask2_np[200:320] = True
    out2 = jax.block_until_ready(
        chunk_dropout_apply(x2, mask2_np, tile_b=8, tile_l=128))
    ref2 = np.asarray(x2).copy()
    ref2[:, mask2_np] = 0.0
    np.testing.assert_array_equal(np.asarray(out2), ref2)

    # --- Eval-mode path: identity.
    mod.training = False
    out_eval = jax.block_until_ready(mod(x))
    np.testing.assert_array_equal(np.asarray(out_eval), np.asarray(x))

    print("KERNEL_OK")
</pallas_src>

<mosaic_0001>
module attributes {stable_mosaic.version = 11 : i64} {
  func.func @_chunk_dropout_kernel(%arg0: i32, %arg1: i32, %arg2: memref<8x256xf32, #tpu.memory_space<vmem>>, %arg3: memref<1x256xf32, #tpu.memory_space<vmem>>, %arg4: memref<8x256xf32, #tpu.memory_space<vmem>>) attributes {dimension_semantics = [#tpu.dimension_semantics<parallel>, #tpu.dimension_semantics<parallel>], iteration_bounds = array<i64: 1, 1>, scalar_prefetch = 0 : i64, scratch_operands = 0 : i64, tpu.core_type = #tpu.core_type<tc>, window_params = [{transform_indices = @transform_0, window_bounds = array<i64: 8, 256>}, {transform_indices = @transform_1, window_bounds = array<i64: 1, 256>}, {transform_indices = @transform_2, window_bounds = array<i64: 8, 256>}]} {
    %c0 = arith.constant 0 : index
    %c0_0 = arith.constant 0 : index
    %0 = vector.load %arg2[%c0, %c0_0] : memref<8x256xf32, #tpu.memory_space<vmem>>, vector<8x256xf32>
    %c0_1 = arith.constant 0 : index
    %c0_2 = arith.constant 0 : index
    %1 = vector.load %arg3[%c0_1, %c0_2] : memref<1x256xf32, #tpu.memory_space<vmem>>, vector<1x256xf32>
    %cst = arith.constant 0.000000e+00 : f32
    %2 = vector.broadcast %cst : f32 to vector<1x256xf32>
    %3 = arith.cmpf one, %1, %2 : vector<1x256xf32>
    %cst_3 = arith.constant 0.000000e+00 : f32
    %4 = vector.broadcast %cst_3 : f32 to vector<8x256xf32>
    %5 = vector.shape_cast %3 : vector<1x256xi1> to vector<1x256xi1>
    %6 = vector.broadcast %5 : vector<1x256xi1> to vector<8x256xi1>
    %7 = arith.select %6, %4, %0 : vector<8x256xi1>, vector<8x256xf32>
    %c0_4 = arith.constant 0 : index
    %c0_5 = arith.constant 0 : index
    %8 = vector.load %arg4[%c0_4, %c0_5] : memref<8x256xf32, #tpu.memory_space<vmem>>, vector<8x256xf32>
    tpu.vector_store %arg4[%c0_4, %c0_5], %7 {strides = array<i32>} : memref<8x256xf32, #tpu.memory_space<vmem>>, vector<8x256xf32>,
    return
  }
  func.func @transform_0(%arg0: i32, %arg1: i32) -> (i32, i32) {
    %c0_i32 = arith.constant 0 : i32
    return %arg0, %arg1 : i32, i32
  }
  func.func @transform_1(%arg0: i32, %arg1: i32) -> (i32, i32) {
    %c0_i32 = arith.constant 0 : i32
    %c0_i32_0 = arith.constant 0 : i32
    return %c0_i32, %arg1 : i32, i32
  }
  func.func @transform_2(%arg0: i32, %arg1: i32) -> (i32, i32) {
    %c0_i32 = arith.constant 0 : i32
    return %arg0, %arg1 : i32, i32
  }
}

</mosaic_0001>

<bundles_post_ra>
// kernel: tpu_custom_call.1
= control target key start
LH: loop header
LB: loop body
LE: loop exit
PB: predicated region body
PF: predicated region fallthrough
CT: control target
= control target key end

     0   :  { %7 = vsyncpa [#allocation3], 0  ;;  %s169_s0 = inlined_call_operand.hbm [shape: f32[8,256], index: 0, kind: input, shape index: {}]   ;;  %s170_s1 = inlined_call_operand.hbm [shape: f32[1,256], index: 1, kind: input, shape index: {}]   ;;  %s171_s2 = inlined_call_operand.hbm [shape: f32[8,256], index: 2, kind: output, shape index: {}]  }
   0x1   :  { %8 = vsyncpa [#allocation6], 0 }
   0x2   :  { %9 = vsyncpa [#allocation4], 0  ;;  %s141_s9 = smov [#allocation2]   ;;  %s142_s11 = smov [#allocation5]  }
   0x3   :  { %s16_s10 = sshll.u32 %s141_s9, 4  ;;  %s26_s12 = sshll.u32 %s142_s11, 4  ;;  %s17_s10 = int_to_ptr.vmem [resolvable:$true] %s16_s10  ;;  %s27_s12 = int_to_ptr.vmem [resolvable:$true] %s26_s12 }
   0x4   :  { %s83_s13 = scalar_lea.vmem %s17_s10, 256  ;;  %p88_p1 = scmp.lt.s32.totalorder %s17_s10, %s17_s10 }
   0x5   :  { %p84_p0 = scmp.ne.s32.totalorder %s17_s10, %s83_s13  ;;  %p89_p2 = scmp.lt.s32.totalorder %s83_s13, %s83_s13 }
   0x7   :  { %p90_p3 = por %p89_p2, %p88_p1 }
   0x9   :  { %p91_p4 = pnand %p90_p3, %p84_p0 }
   0xb   :  { %94 = shalt.err (!%p91_p4)
}
   0xc   :  { %19 = dma.hbm_to_vmem [thread:$0]  %s169_s0, 256, %s17_s10, [#allocation3]  }
   0xd   :  { %s103_s16 = scalar_lea.vmem %s27_s12, 32  ;;  %p108_p6 = scmp.lt.s32.totalorder %s27_s12, %s27_s12 }
   0xe   :  { %p104_p5 = scmp.ne.s32.totalorder %s27_s12, %s103_s16  ;;  %p109_p7 = scmp.lt.s32.totalorder %s103_s16, %s103_s16 }
  0x10   :  { %p110_p8 = por %p109_p7, %p108_p6 }
  0x12   :  { %p111_p9 = pnand %p110_p8, %p104_p5 }
  0x14   :  { %114 = shalt.err (!%p111_p9)
}
  0x15   :  { %29 = dma.hbm_to_vmem [thread:$0]  %s170_s1, 32, %s27_s12, [#allocation6]  }
  0x16   :  { %135 = dma.done.wait [#allocation3], 256  }
  0x17   :  { %136 = vsyncadd [#allocation3], 4294967040 }
  0x18   :  { %137 = dma.done.wait [#allocation6], 32  }
  0x19   :  { %138 = vsyncadd [#allocation6], 4294967264  ;;  %v41_v0 = vlaneseq  ;;  %v38_v4 = vld [vmem:[#allocation5] sm:$0x3]  ;;  %v143_v5 = vmov 0   ;;  %s144_s0 = smov [#allocation7]  }
  0x1a   :  { %vm39_vm0 = vcmp.ne.f32.partialorder %v38_v4, 0.0  ;;  %s61_s19 = sshll.u32 %s144_s0, 4  ;;  %v36_v7 = vld [vmem:[#allocation2] sm:$0xff]  ;;  %v37_v9 = vld [vmem:[#allocation2 + $0x8] sm:$0xff]  ;;  %s62_s19 = int_to_ptr.vmem [resolvable:$true] %s61_s19 }
  0x1b   :  { %v42_v1 = vshrl.u32 %v41_v0, 7  ;;  %v40_v6 = vsel %vm39_vm0, 1, %v143_v5  ;;  %s115_s1 = scalar_lea.vmem %s62_s19, 256  ;;  %p120_p11 = scmp.lt.s32.totalorder %s62_s19, %s62_s19 }
  0x1c   :  { %p116_p10 = scmp.ne.s32.totalorder %s62_s19, %s115_s1  ;;  %p121_p12 = scmp.lt.s32.totalorder %s115_s1, %s115_s1 }
  0x1d   :  { %v43_v2 = vsub.s32 0, %v42_v1  ;;  %v47_v3 = vsub.s32 1, %v42_v1 }
  0x1e   :  { %p122_p13 = por %p121_p12, %p120_p11 }
  0x1f   :  { %v44_v8 = vrot.slane %v40_v6, %v43_v2  ;;  %v48_v10 = vrot.slane %v40_v6, %v47_v3 }
  0x20   :  { %p123_p0 = pnand %p122_p13, %p116_p10 }
  0x21   :  { %vm49_vm1 = vcmp.eq.s32.totalorder %v44_v8, 1  ;;  %vm50_vm2 = vcmp.eq.s32.totalorder %v48_v10, 1 }
  0x22   :  { %v51_v11 = vsel %vm49_vm1, 0.0, %v36_v7  ;;  %v52_v12 = vsel %vm50_vm2, 0.0, %v37_v9 }
  0x23   :  { %53 = vst [vmem:[#allocation7] sm:$0xff] %v51_v11  ;;  %54 = vst [vmem:[#allocation7 + $0x8] sm:$0xff] %v52_v12 }
  0x24   :  { %126 = shalt.err (!%p123_p0)
}
  0x25   :  { %64 = dma.vmem_to_hbm [thread:$0]  %s62_s19, 256, %s171_s2, [#allocation4]  }
  0x26   :  { %139 = dma.done.wait [#allocation4], 256  }
  0x27   :  { %140 = vsyncadd [#allocation4], 4294967040 }
  0x28   :  { %68 = vsyncpa [#allocation3], 1 }
  0x29   :  { %69 = vsyncpa [#allocation6], 1 }
  0x2a   :  { %70 = vsyncpa [#allocation4], 1 }

</bundles_post_ra>
